<compile_context>
chip_gen: v6e
topology: v6e:2x2x1
jax: 0.10.0
libtpu: 0.0.40
codegen_flags: <defaults>
</compile_context>

<pallas_src>
import functools

import jax
import jax.numpy as jnp
from jax.experimental import pallas as pl
from jax.experimental.pallas import tpu as pltpu


def _attention_conv_kernel(x_ref, w_ref, rel_ref, o_ref, *, out_channels):
    """Fused projection + rel add + softmax + weighted sum for one (batch, spatial-tile).

      x_ref:   (C, T)      input tile, lanes = spatial positions
      w_ref:   (3*OC, C)   [wq; wk; wv] stacked (whole array, VMEM-resident)
      rel_ref: (OC, R)     rel_h rows for the first OC//2 channels, rel_w for the rest
      o_ref:   (OC, T)     output tile (channel-first, lane-dense)
    """
    oc = out_channels
    x = x_ref[...]                                                     # (C, T)
    # Fused q/k/v 1x1x1 convs as a single MXU matmul: (3*OC, C) @ (C, T).
    qkv = jnp.dot(w_ref[...], x, preferred_element_type=jnp.float32)   # (3*OC, T)
    q = qkv[:oc, :]
    k = qkv[oc:2 * oc, :]
    v = qkv[2 * oc:, :]

    rel = rel_ref[...]                                                 # (OC, R)
    # logits[c, r, t] = q[c, t] * (k[c, t] + rel[c, r])
    logits = q[:, None, :] * (k[:, None, :] + rel[:, :, None])         # (OC, R, T)
    m = jnp.max(logits, axis=1, keepdims=True)                         # stable softmax over R
    e = jnp.exp(logits - m)
    inv = pl.reciprocal(jnp.sum(e, axis=1, keepdims=True), approx=True)  # EUP reciprocal
    p = e * inv                                                        # softmax weights
    # einsum('bnchwk,bnchwk->bnchw') with v's size-1 k-dim broadcasting over the softmax axis:
    o_ref[...] = jnp.sum(p * v[:, None, :], axis=1).astype(o_ref.dtype)  # (OC, T)


def _pick_spatial_tile(batch, spatial, in_channels, out_channels, window,
                       vmem_budget_bytes=8 * 1024 * 1024):
    """Largest multiple-of-128 spatial tile fitting a conservative VMEM budget."""
    if spatial % 128 != 0:
        return spatial  # full-extent lane dim is always a legal block shape
    # f32 bytes per spatial lane: double-buffered x & out blocks + qkv + logits/e/p.
    per_lane = 4 * (2 * in_channels + 2 * out_channels + 3 * out_channels
                    + 3 * out_channels * window)
    tile = (vmem_budget_bytes // per_lane) // 128 * 128
    tile = int(max(128, min(2048, tile, spatial)))
    # Keep >= 2 total grid steps so both v7x TensorCores get work.
    if batch * pl.cdiv(spatial, tile) < 2 and tile % 256 == 0:
        tile //= 2
    return tile


def init_attention_conv_params(key, in_channels, out_channels, kernel_size=1):
    """Deterministic parameter init mirroring the module's reset_parameters()."""
    kq, kk, kv, krh, krw = jax.random.split(key, 5)
    fan_out = out_channels * kernel_size ** 3            # kaiming_normal_ mode='fan_out'
    std = (2.0 / fan_out) ** 0.5
    shape_w = (out_channels, in_channels)                 # Conv3d 1x1x1 weight (trailing 1s squeezed)
    return {
        "wq": std * jax.random.normal(kq, shape_w, jnp.float32),
        "wk": std * jax.random.normal(kk, shape_w, jnp.float32),
        "wv": std * jax.random.normal(kv, shape_w, jnp.float32),
        "rel_h": jax.random.normal(krh, (out_channels // 2, 1, 1, kernel_size, 1), jnp.float32),
        "rel_w": jax.random.normal(krw, (out_channels // 2, 1, 1, 1, kernel_size), jnp.float32),
    }


def attention_conv_forward(x, params, *, out_channels, kernel_size=1, stride=1,
                           padding=0, groups=1):
    B, C, Fr, H, W = x.shape
    OC = out_channels
    R = OC // 2
    # Only configuration for which the reference PyTorch forward actually runs:
    # TODO(synk): general kernel_size/frame/padding has no valid torch reference to translate.
    assert Fr == 1 and kernel_size == 1 and stride == 1 and padding == 0
    assert OC % groups == 0 and OC % 2 == 0
    # `groups` only appears in the torch code as a reshape of the channel axis; the
    # softmax axis and the final (B, OC, H, W) output are unaffected, so the fused
    # kernel does not need it beyond the divisibility assert above.

    rel_h = params["rel_h"].reshape(R)
    rel_w = params["rel_w"].reshape(R)
    # rel_sel[c, r]: rel_h for the first OC//2 output channels, rel_w for the rest.
    rel_sel = jnp.concatenate(
        [jnp.broadcast_to(rel_h[None, :], (R, R)),
         jnp.broadcast_to(rel_w[None, :], (OC - R, R))], axis=0)       # (OC, R)

    w_all = jnp.concatenate([params["wq"], params["wk"], params["wv"]], axis=0)  # (3*OC, C)

    S = H * W
    x3 = x.reshape(B, C, S)             # frame == 1: free, layout-preserving reshape
    tile_s = _pick_spatial_tile(B, S, C, OC, R)

    out3 = pl.pallas_call(
        functools.partial(_attention_conv_kernel, out_channels=OC),
        out_shape=jax.ShapeDtypeStruct((B, OC, S), jnp.float32),
        grid=(B, pl.cdiv(S, tile_s)),
        in_specs=[
            pl.BlockSpec((None, C, tile_s), lambda b, s: (b, 0, s)),   # x: lanes = spatial
            pl.BlockSpec((3 * OC, C), lambda b, s: (0, 0)),            # stacked weights
            pl.BlockSpec((OC, R), lambda b, s: (0, 0)),                # rel table
        ],
        out_specs=pl.BlockSpec((None, OC, tile_s), lambda b, s: (b, 0, s)),
        compiler_params=pltpu.CompilerParams(
            dimension_semantics=("parallel", "parallel")),
    )(x3, w_all, rel_sel)

    # torch: .view(batch, -1, height, width) — already channel-first, free reshape.
    return out3.reshape(B, OC, H, W)


def _reference_forward(x, params, *, out_channels, groups):
    # Pure-jnp, exact torch-equivalent reference (reproduces the flat .view scrambling).
    B, C, Fr, H, W = x.shape
    OC = out_channels; R = OC // 2; g = groups; Cg = OC // g
    wq, wk, wv = params["wq"], params["wk"], params["wv"]
    rel_h = params["rel_h"].reshape(R); rel_w = params["rel_w"].reshape(R)
    q = jnp.einsum("oc,bcfhw->bofhw", wq, x)[:, :, 0]
    k = jnp.einsum("oc,bcfhw->bofhw", wk, x)[:, :, 0]
    v = jnp.einsum("oc,bcfhw->bofhw", wv, x)[:, :, 0]
    rel_sel = jnp.concatenate([jnp.tile(rel_h[None], (R, 1)),
                               jnp.tile(rel_w[None], (OC - R, 1))], axis=0)
    kc = k[:, :, None] + rel_sel[None, :, :, None, None]
    k6 = kc.reshape(B, g, Cg, H, W, R)
    q6 = q.reshape(B, g, Cg, H, W, 1)
    v6 = v.reshape(B, g, Cg, H, W, 1)
    p = jax.nn.softmax(q6 * k6, axis=-1)
    return jnp.sum(p * v6, axis=-1).reshape(B, -1, H, W)


if __name__ == "__main__":
    key = jax.random.PRNGKey(0)
    in_channels, out_channels, groups = 4, 8, 2
    B, Fr, H, W = 2, 1, 16, 16      # frame=1 (required for the module's views to be valid)

    pkey, xkey = jax.random.split(key)
    params = init_attention_conv_params(pkey, in_channels, out_channels, kernel_size=1)
    x = jax.random.normal(xkey, (B, in_channels, Fr, H, W), jnp.float32)

    out = attention_conv_forward(x, params, out_channels=out_channels,
                                 kernel_size=1, stride=1, padding=0, groups=groups)
    out = jax.block_until_ready(out)

    ref = _reference_forward(x, params, out_channels=out_channels, groups=groups)
    assert out.shape == (B, out_channels, H, W)
    assert bool(jnp.allclose(out, ref, rtol=1e-2, atol=1e-2)), \
        float(jnp.max(jnp.abs(out - ref)))
    print("KERNEL_OK")
</pallas_src>

<mosaic_0001>
module attributes {stable_mosaic.version = 11 : i64} {
  func.func @_attention_conv_kernel(%arg0: i32, %arg1: i32, %arg2: memref<1x4x256xf32, #tpu.memory_space<vmem>>, %arg3: memref<24x4xf32, #tpu.memory_space<vmem>>, %arg4: memref<8x4xf32, #tpu.memory_space<vmem>>, %arg5: memref<1x8x256xf32, #tpu.memory_space<vmem>>) attributes {dimension_semantics = [#tpu.dimension_semantics<parallel>, #tpu.dimension_semantics<parallel>], iteration_bounds = array<i64: 2, 1>, scalar_prefetch = 0 : i64, scratch_operands = 0 : i64, tpu.core_type = #tpu.core_type<tc>, window_params = [{transform_indices = @transform_0, window_bounds = array<i64: 1, 4, 256>}, {pipeline_mode = #tpu.pipeline_mode<synchronous>, transform_indices = @transform_1, window_bounds = array<i64: 24, 4>}, {pipeline_mode = #tpu.pipeline_mode<synchronous>, transform_indices = @transform_2, window_bounds = array<i64: 8, 4>}, {transform_indices = @transform_3, window_bounds = array<i64: 1, 8, 256>}]} {
    %c0 = arith.constant 0 : index
    %c0_0 = arith.constant 0 : index
    %c0_1 = arith.constant 0 : index
    %0 = vector.load %arg2[%c0, %c0_0, %c0_1] : memref<1x4x256xf32, #tpu.memory_space<vmem>>, vector<1x4x256xf32>
    %1 = vector.shape_cast %0 : vector<1x4x256xf32> to vector<4x256xf32>
    %c0_2 = arith.constant 0 : index
    %c0_3 = arith.constant 0 : index
    %2 = vector.load %arg3[%c0_2, %c0_3] : memref<24x4xf32, #tpu.memory_space<vmem>>, vector<24x4xf32>
    %cst = arith.constant dense<0.000000e+00> : vector<24x256xf32>
    %3 = tpu.matmul %2, %1, %cst {dimension_numbers = #tpu.dot_dimension_numbers<[1], [0], [0], [1], [0, 0, 1, 1], [], []>} : vector<24x4xf32>, vector<4x256xf32>, vector<24x256xf32> -> vector<24x256xf32>
    %4 = vector.extract_strided_slice %3 {offsets = [0, 0], sizes = [8, 256], strides = [1, 1]} : vector<24x256xf32> to vector<8x256xf32>
    %5 = vector.extract_strided_slice %3 {offsets = [8, 0], sizes = [8, 256], strides = [1, 1]} : vector<24x256xf32> to vector<8x256xf32>
    %6 = vector.extract_strided_slice %3 {offsets = [16, 0], sizes = [8, 256], strides = [1, 1]} : vector<24x256xf32> to vector<8x256xf32>
    %c0_4 = arith.constant 0 : index
    %c0_5 = arith.constant 0 : index
    %7 = vector.load %arg4[%c0_4, %c0_5] : memref<8x4xf32, #tpu.memory_space<vmem>>, vector<8x4xf32>
    %8 = vector.shape_cast %4 : vector<8x256xf32> to vector<8x1x256xf32>
    %9 = vector.shape_cast %5 : vector<8x256xf32> to vector<8x1x256xf32>
    %10 = vector.shape_cast %7 : vector<8x4xf32> to vector<8x4x1xf32>
    %11 = vector.broadcast %9 : vector<8x1x256xf32> to vector<8x4x256xf32>
    %12 = vector.broadcast %10 : vector<8x4x1xf32> to vector<8x4x256xf32>
    %13 = arith.addf %11, %12 : vector<8x4x256xf32>
    %14 = vector.broadcast %8 : vector<8x1x256xf32> to vector<8x4x256xf32>
    %15 = arith.mulf %14, %13 : vector<8x4x256xf32>
    %cst_6 = arith.constant dense<0xFF800000> : vector<8x256xf32>
    %16 = vector.multi_reduction <maximumf>, %15, %cst_6 [1] : vector<8x4x256xf32> to vector<8x256xf32>
    %17 = vector.shape_cast %16 : vector<8x256xf32> to vector<8x1x256xf32>
    %18 = vector.broadcast %17 : vector<8x1x256xf32> to vector<8x4x256xf32>
    %19 = arith.subf %15, %18 : vector<8x4x256xf32>
    %20 = math.exp %19 : vector<8x4x256xf32>
    %cst_7 = arith.constant dense<0.000000e+00> : vector<8x256xf32>
    %21 = vector.multi_reduction <add>, %20, %cst_7 [1] : vector<8x4x256xf32> to vector<8x256xf32>
    %22 = vector.shape_cast %21 : vector<8x256xf32> to vector<8x1x256xf32>
    %23 = tpu.reciprocal %22 {approx = true} : vector<8x1x256xf32> -> vector<8x1x256xf32>
    %24 = vector.broadcast %23 : vector<8x1x256xf32> to vector<8x4x256xf32>
    %25 = arith.mulf %20, %24 : vector<8x4x256xf32>
    %26 = vector.shape_cast %6 : vector<8x256xf32> to vector<8x1x256xf32>
    %27 = vector.broadcast %26 : vector<8x1x256xf32> to vector<8x4x256xf32>
    %28 = arith.mulf %25, %27 : vector<8x4x256xf32>
    %cst_8 = arith.constant dense<0.000000e+00> : vector<8x256xf32>
    %29 = vector.multi_reduction <add>, %28, %cst_8 [1] : vector<8x4x256xf32> to vector<8x256xf32>
    %c0_9 = arith.constant 0 : index
    %c0_10 = arith.constant 0 : index
    %c0_11 = arith.constant 0 : index
    %30 = vector.load %arg5[%c0_9, %c0_10, %c0_11] : memref<1x8x256xf32, #tpu.memory_space<vmem>>, vector<1x8x256xf32>
    %31 = vector.shape_cast %30 : vector<1x8x256xf32> to vector<8x256xf32>
    %32 = vector.shape_cast %29 : vector<8x256xf32> to vector<1x8x256xf32>
    tpu.vector_store %arg5[%c0_9, %c0_10, %c0_11], %32 {strides = array<i32>} : memref<1x8x256xf32, #tpu.memory_space<vmem>>, vector<1x8x256xf32>,
    return
  }
  func.func @transform_0(%arg0: i32, %arg1: i32) -> (i32, i32, i32) {
    %c0_i32 = arith.constant 0 : i32
    %c0_i32_0 = arith.constant 0 : i32
    return %arg0, %c0_i32, %arg1 : i32, i32, i32
  }
  func.func @transform_1(%arg0: i32, %arg1: i32) -> (i32, i32) {
    %c0_i32 = arith.constant 0 : i32
    %c0_i32_0 = arith.constant 0 : i32
    %c0_i32_1 = arith.constant 0 : i32
    return %c0_i32, %c0_i32_0 : i32, i32
  }
  func.func @transform_2(%arg0: i32, %arg1: i32) -> (i32, i32) {
    %c0_i32 = arith.constant 0 : i32
    %c0_i32_0 = arith.constant 0 : i32
    %c0_i32_1 = arith.constant 0 : i32
    return %c0_i32, %c0_i32_0 : i32, i32
  }
  func.func @transform_3(%arg0: i32, %arg1: i32) -> (i32, i32, i32) {
    %c0_i32 = arith.constant 0 : i32
    %c0_i32_0 = arith.constant 0 : i32
    return %arg0, %c0_i32, %arg1 : i32, i32, i32
  }
}

</mosaic_0001>

<bundles_post_ra>
// kernel: tpu_custom_call.1
= control target key start
LH: loop header
LB: loop body
LE: loop exit
PB: predicated region body
PF: predicated region fallthrough
CT: control target
= control target key end

     0   :  { %8 = vsyncpa [#allocation3], 0  ;;  %s2104_s0 = inlined_call_operand.vmem [shape: f32[2,4,256], index: 0, kind: input, shape index: {}]   ;;  %s2105_s1 = inlined_call_operand.vmem [shape: f32[24,4], index: 1, kind: input, shape index: {}]   ;;  %s2106_s2 = inlined_call_operand.vmem [shape: f32[8,4], index: 2, kind: input, shape index: {}]   ;;  %s2107_s3 = inlined_call_operand.hbm [shape: f32[2,8,256], index: 3, kind: output, shape index: {}]  }
   0x1   :  { %10 = vsyncpa [#allocation3 + $0x1], 0  ;;  %s1600_s12 = smov 0   ;;  %s1602_s13 = smov 0  }
   0x2   :  { %s1604_s14 = smov 0   ;;  %s1606_s15 = smov 0  }
   0x3   :  { %s1608_s16 = smov 0   ;;  %s1610_s17 = smov 0  }
   0x4 LB: > { %s1355_s18 = sadd.s32 4294967295, %s1575_s17   ;;  %s1356_s19 = sadd.s32 4294967294, %s1575_s17   ;;  %s1575_s17 = sphi %s1610_s17, %s16_s17   ;;  %s1571_s16 = sphi %s1608_s16, %s2114_s16   ;;  %s1567_s15 = sphi %s1606_s15, %s2113_s15   ;;  %s1563_s14 = sphi %s1604_s14, %s2112_s14   ;;  %s1559_s13 = sphi %s1602_s13, %s2111_s13   ;;  %s1555_s12 = sphi %s1600_s12, %s2110_s12  }
   0x5   : > { %s28_s20 = sadd.s32 1, %s1571_s16  ;;  %s107_s21 = sadd.s32 1, %s1563_s14 }
   0x6   : > { %p30_p0 = scmp.ge.s32.totalorder %s28_s20, 2  ;;  %p117_p1 = scmp.ne.s32.totalorder %s1563_s14, %s1559_s13 }
   0x7   : > { %p118_p2 = scmp.eq.s32.totalorder %s1355_s18, 1  ;;  %p123_p3 = scmp.ne.s32.totalorder %s1559_s13, %s1555_s12 }
   0x8   : > { %s2116_s20 = smov (%p30_p0, %s28_s20), 0  ;;  %p124_p5 = scmp.eq.s32.totalorder %s1356_s19, 1 }
   0x9   : > { %p1640_p4 = por %p118_p2, %p117_p1  ;;  %s102_s23 = ssub.s32 %s1571_s16, %s2116_s20 }
   0xa   : > { %p1359_p6 = scmp.ge.s32.totalorder %s1575_s17, 1  ;;  %p105_p7 = scmp.eq.s32.totalorder %s102_s23, 0 }
   0xb   : > { %p1647_p8 = por %p124_p5, %p123_p3  ;;  %p161_p9 = scmp.lt.s32.totalorder %s1575_s17, 3 }
   0xc   : > { %s1653_s25 = scalar_select %p105_p7, %s1563_s14, %s107_s21  }
   0xd   : > { %p162_p10 = pnand %p1359_p6, %p161_p9 }
   0xe   : > { %p190_p11 = scmp.lt.s32.totalorder (!%p162_p10), %s1567_s15, 1  ;;  %s186_s18 = sand.u32 (!%p162_p10), 1, %s1559_s13  }
   0xf   : > { %165 = sbr.rel (%p162_p10) target bundleno = 387 (0x183), region = 32  ;;  %s1360_s19 = sshll.u32 (!%p162_p10), %s186_s18, 4 }
  0x10   : > { %s1374_s21 = sshll.u32 (!%p162_p10), %s1567_s15, 8  ;;  %s188_s23 = scalar_lea.vmem (!%p162_p10), [#allocation2], %s1360_s19 }
  0x11   : > { %s1579_s4 = smov (!%p162_p10), [#allocation2]  }
  0x14   : > { %v312_v0 = vlaneseq  ;;  %v1577_v1 = vmov 0.0   ;;  %s191_s26 = scalar_select %p190_p11, %s1567_s15, 1  ;;  %v304_v3 = vld [vmem:[%s2106_s2] sm:$0xff]  ;;  %vm216_vm0 = vcmask 1043456   ;;  %vm206_vm1 = vcmask 31744   ;;  %v202_v13 = vld [vmem:[%s2105_s1 + $0x8] sm:$0xff] }
  0x15   : > { %285 = vmatprep.mubr.f32.mxu0 %v1577_v1  ;;  %291 = vmatprep.mubr.f32.mxu1 %v1577_v1  ;;  %v201_v12 = vld [vmem:[%s2105_s1] sm:$0xff]  ;;  %v203_v18 = vld [vmem:[%s2105_s1 + $0x10] sm:$0xff]  ;;  %v1578_v25 = vmov 1966171168   ;;  %vm1237_vm2 = vcmask 1041409   ;;  %vm1239_vm3 = vcmask 1042434  }
  0x16   : > { %v313_v2 = vshrl.u32 %v312_v0, 7  ;;  %s1373_s29 = sshll.u32 %s191_s26, 3  ;;  %v310_v26 = vunpack.c.l.s4 %v1578_v25  ;;  %vm1241_vm4 = vcmask 1043459   ;;  %vm1243_vm5 = vcmask 1044484   ;;  %s1279_s26 = sshll.u32 %s188_s23, 4  ;;  %s2058_s26 = int_to_ptr.vmem [resolvable:$true] %s1279_s26 }
  0x17   : > { %s197_s5 = scalar_lea.vmem %s2104_s0, %s1373_s29  ;;  %vm1245_vm6 = vcmask 1045509   ;;  %vm1247_vm7 = vcmask 1046534   ;;  %vm1249_vm8 = vcmask 1047559   ;;  %s2056_s29 = scalar_lea.hbm %s2107_s3, %s1374_s21 }
  0x18   : > { %v1660_v4 = vsub.s32 0, %v313_v2  ;;  %v425_v5 = vsub.s32 2, %v313_v2  ;;  %v1662_v6 = vsub.s32 1, %v313_v2  ;;  %v432_v7 = vsub.s32 3, %v313_v2  ;;  %v200_v8 = vld [vmem:[%s197_s5] sm:$0xff]  ;;  %s1263_s15 = scalar_lea.sflag [#allocation3], %s186_s18 }
  0x19   : > { %v205_v11 = vcombine.high %v200_v8, %v200_v8  ;;  %v439_v15 = vsub.s32 4, %v313_v2  ;;  %v446_v17 = vsub.s32 5, %v313_v2  ;;  %v453_v20 = vsub.s32 6, %v313_v2  ;;  %s1499_s30 = scalar_lea.vmem %s2058_s26, 256  ;;  %s1503_s5 = sshll.u32 %s1579_s4, 4  ;;  %s1504_s5 = int_to_ptr.vmem [resolvable:$false] %s1503_s5 }
  0x1a   : > { %v412_v9 = vrot.slane %v304_v3, %v1660_v4  ;;  %v426_v10 = vrot.slane %v304_v3, %v425_v5  ;;  %v419_v14 = vrot.slane %v304_v3, %v1662_v6  ;;  %v433_v16 = vrot.slane %v304_v3, %v432_v7  ;;  %p1500_p12 = scmp.ne.s32.totalorder %s2058_s26, %s1499_s30  ;;  %s1505_s6 = scalar_lea.vmem %s1504_s5, 512 }
  0x1b   : > { %1363 = vmatprep.subr.msk.mxu0 %vm216_vm0, %v205_v11  ;;  %1375 = vmatprep.subr.msk.mxu1 %vm216_vm0, %v205_v11  ;;  %v440_v19 = vrot.slane %v304_v3, %v439_v15  ;;  %v447_v21 = vrot.slane %v304_v3, %v446_v17  ;;  %v460_v22 = vsub.s32 7, %v313_v2  ;;  %v454_v23 = vrot.slane %v304_v3, %v453_v20  ;;  %p1506_p1 = scmp.lt.s32.totalorder %s2058_s26, %s1504_s5  ;;  %p1507_p2 = scmp.lt.s32.totalorder %s1505_s6, %s1499_s30 }
  0x1c   : > { %414 = vbcast.lane.b32.xlu0 %v412_v9, 256  ;;  %428 = vbcast.lane.b32.xlu1 %v426_v10, 256  ;;  %v311_v27 = vunpack.c.0.s8 %v310_v26  ;;  %p1501_p13 = pnand %p1500_p12, %p1640_p4 }
  0x1d   : > { %1364 = vmatpush1.msk.msra.mxu0 %vm216_vm0, %v200_v8  ;;  %1376 = vmatpush1.msk.msra.mxu1 %vm216_vm0, %v200_v8  ;;  %v461_v24 = vrot.slane %v304_v3, %v460_v22  ;;  %p1508_p3 = por %p1507_p2, %p1506_p1 }
  0x1e   : > { %1365 = vmatmul.mubr.msk.f32.vlgmr.msra.gmra.mxu0 %vm206_vm1, %v201_v12  ;;  %1366 = vmatmul.mubr.msk.f32.vlgmr.msra.gmra.mxu1 %vm206_vm1, %v202_v13  ;;  %v1685_v30 = vsub.s32 %v311_v27, %v313_v2  ;;  %p1502_p0 = pneg %p1501_p13 }
  0x1f   : > { %297 = vmatprep.mubr.f32.mxu1 %v1577_v1 }
  0x20   : > { %421 = vbcast.lane.b32.xlu0 %v419_v14, 256  ;;  %435 = vbcast.lane.b32.xlu1 %v433_v16, 256  ;;  %p1509_p5 = pnand %p1508_p3, %p1502_p0 }
  0x22   : > { %1367 = vmatmul.mubr.msk.f32.gmra.mxu1 %vm206_vm1, %v203_v18 }
  0x24   : > { %442 = vbcast.lane.b32.xlu0 %v440_v19, 256  ;;  %449 = vbcast.lane.b32.xlu1 %v447_v21, 256 }
  0x28   : > { %456 = vbcast.lane.b32.xlu0 %v454_v23, 256  ;;  %463 = vbcast.lane.b32.xlu1 %v461_v24, 256 }
  0x8e   : > { %v415_v41 = vpop.permute.xlu0 %414  ;;  %v429_v2 = vpop.permute.xlu1 %428 }
  0x92   : > { %v422_v7 = vpop.permute.xlu0 %421 }
  0xde   : > { %v287_v28 = vpop.f32.mrf.mxu0  ;;  %v293_v29 = vpop.f32.mrf.mxu1 }
  0xe0   : > { %v289_v31 = vpop.f32.mrf.mxu0  ;;  %v295_v32 = vpop.f32.mrf.mxu1 }
  0xe1   : > { %v307_v33 = vcombine.low %v287_v28, %v289_v31  ;;  %v308_v34 = vcombine.high %v287_v28, %v289_v31  ;;  %v359_v35 = vcombine.low %v293_v29, %v295_v32  ;;  %v360_v36 = vcombine.high %v293_v29, %v295_v32 }
  0xe3   : > { %v315_v37 = vrot.slane %v307_v33, %v1685_v30  ;;  %v322_v38 = vrot.slane %v308_v34, %v1685_v30  ;;  %v367_v39 = vrot.slane %v359_v35, %v1685_v30  ;;  %v374_v40 = vrot.slane %v360_v36, %v1685_v30 }
  0xe5   : > { %v323_v42 = vcombine.high %v315_v37, %v315_v37  ;;  %v324_v43 = vcombine.high %v322_v38, %v322_v38  ;;  %v331_v44 = vrot.slane %v315_v37, %v1685_v30  ;;  %v1693_v45 = vrot.slane %v322_v38, %v1685_v30 }
  0xe6   : > { %v375_v46 = vcombine.high %v367_v39, %v367_v39  ;;  %v376_v47 = vcombine.high %v374_v40, %v374_v40  ;;  %v383_v48 = vrot.slane %v367_v39, %v1685_v30  ;;  %v1697_v49 = vrot.slane %v374_v40, %v1685_v30  ;;  %v436_v39 = vpop.permute.xlu1 %435 }
  0xe7   : > { %v345_v50 = vrot.slane %v323_v42, %v1685_v30  ;;  %v1701_v51 = vrot.slane %v324_v43, %v1685_v30  ;;  %v353_v52 = vcombine.high %v331_v44, %v331_v44  ;;  %v564_v53 = vrot.slane %v331_v44, %v1660_v4 }
  0xe8   : > { %v568_v54 = vrot.slane %v331_v44, %v1662_v6  ;;  %v397_v55 = vrot.slane %v375_v46, %v1685_v30  ;;  %v1707_v56 = vrot.slane %v376_v47, %v1685_v30  ;;  %v405_v57 = vcombine.high %v383_v48, %v383_v48 }
  0xe9   : > { %v580_v58 = vrot.slane %v353_v52, %v1660_v4  ;;  %v584_v59 = vrot.slane %v353_v52, %v1662_v6  ;;  %v468_v60 = vrot.slane %v383_v48, %v1660_v4  ;;  %v472_v61 = vrot.slane %v383_v48, %v1662_v6 }
  0xea   : > { %v484_v62 = vrot.slane %v405_v57, %v1660_v4  ;;  %v488_v63 = vrot.slane %v405_v57, %v1662_v6  ;;  %v476_v0 = vrot.slane %v397_v55, %v1660_v4  ;;  %v480_v1 = vrot.slane %v397_v55, %v1662_v6 }
  0xeb   : > { %v545_v3 = vadd.f32 %v468_v60, %v415_v41  ;;  %v546_v5 = vadd.f32 %v472_v61, %v415_v41  ;;  %v572_v8 = vrot.slane %v345_v50, %v1660_v4  ;;  %v576_v9 = vrot.slane %v345_v50, %v1662_v6 }
  0xec   : > { %v549_v10 = vadd.f32 %v484_v62, %v429_v2  ;;  %v550_v11 = vadd.f32 %v488_v63, %v429_v2  ;;  %v547_v12 = vadd.f32 %v476_v0, %v422_v7  ;;  %v548_v13 = vadd.f32 %v480_v1, %v422_v7 }
  0xed   : > { %v1719_v14 = vmul.f32 %v564_v53, %v545_v3  ;;  %v1721_v15 = vmul.f32 %v568_v54, %v546_v5  ;;  %v355_v16 = vcombine.high %v345_v50, %v345_v50  ;;  %v407_v17 = vcombine.high %v397_v55, %v397_v55 }
  0xee   : > { %v1723_v18 = vmul.f32 %v580_v58, %v549_v10  ;;  %v1725_v19 = vmul.f32 %v584_v59, %v550_v11  ;;  %v1727_v20 = vmul.f32 %v572_v8, %v547_v12  ;;  %v1729_v21 = vmul.f32 %v576_v9, %v548_v13 }
  0xef   : > { %v657_v22 = vsel %vm216_vm0, %v1719_v14, -inf  ;;  %v664_v23 = vsel %vm216_vm0, %v1721_v15, -inf  ;;  %v492_v24 = vrot.slane %v407_v17, %v1660_v4  ;;  %v496_v25 = vrot.slane %v407_v17, %v1662_v6 }
  0xf0   : > { %v658_v26 = vrot.slane %v657_v22, 4  ;;  %v665_v27 = vrot.slane %v664_v23, 4  ;;  %v685_v28 = vsel %vm216_vm0, %v1723_v18, -inf  ;;  %v692_v29 = vsel %vm216_vm0, %v1725_v19, -inf }
  0xf1   : > { %v686_v31 = vrot.slane %v685_v28, 4  ;;  %v693_v32 = vrot.slane %v692_v29, 4  ;;  %v671_v33 = vsel %vm216_vm0, %v1727_v20, -inf  ;;  %v678_v34 = vsel %vm216_vm0, %v1729_v21, -inf }
  0xf2   : > { %v659_v35 = vmax.f32 %v657_v22, %v658_v26  ;;  %v666_v36 = vmax.f32 %v664_v23, %v665_v27  ;;  %v672_v37 = vrot.slane %v671_v33, 4  ;;  %v679_v38 = vrot.slane %v678_v34, 4 }
  0xf3   : > { %v687_v40 = vmax.f32 %v685_v28, %v686_v31  ;;  %v694_v41 = vmax.f32 %v692_v29, %v693_v32  ;;  %v551_v42 = vadd.f32 %v492_v24, %v436_v39  ;;  %v552_v43 = vadd.f32 %v496_v25, %v436_v39 }
  0xf4   : > { %v660_v44 = vrot.slane %v659_v35, 2  ;;  %v667_v46 = vrot.slane %v666_v36, 2  ;;  %v673_v47 = vmax.f32 %v671_v33, %v672_v37  ;;  %v680_v48 = vmax.f32 %v678_v34, %v679_v38 }
  0xf5   : > { %v688_v50 = vrot.slane %v687_v40, 2  ;;  %v695_v52 = vrot.slane %v694_v41, 2  ;;  %v588_v53 = vrot.slane %v355_v16, %v1660_v4  ;;  %v592_v54 = vrot.slane %v355_v16, %v1662_v6 }
  0xf6   : > { %v661_v55 = vmax.f32 %v659_v35, %v660_v44  ;;  %v668_v57 = vmax.f32 %v666_v36, %v667_v46  ;;  %v674_v58 = vrot.slane %v673_v47, 2  ;;  %v681_v59 = vrot.slane %v680_v48, 2 }
  0xf7   : > { %v689_v60 = vmax.f32 %v687_v40, %v688_v50  ;;  %v696_v61 = vmax.f32 %v694_v41, %v695_v52  ;;  %v1747_v62 = vmul.f32 %v588_v53, %v551_v42  ;;  %v1749_v63 = vmul.f32 %v592_v54, %v552_v43  ;;  %v443_v42 = vpop.permute.xlu0 %442 }
  0xf8   : > { %v662_v0 = vrot.slane %v661_v55, 1  ;;  %v669_v1 = vrot.slane %v668_v57, 1  ;;  %v675_v2 = vmax.f32 %v673_v47, %v674_v58  ;;  %v682_v3 = vmax.f32 %v680_v48, %v681_v59  ;;  %v450_v58 = vpop.permute.xlu1 %449 }
  0xf9   : > { %v690_v5 = vrot.slane %v689_v60, 1  ;;  %v697_v7 = vrot.slane %v696_v61, 1  ;;  %v699_v8 = vsel %vm216_vm0, %v1747_v62, -inf  ;;  %v706_v9 = vsel %vm216_vm0, %v1749_v63, -inf }
  0xfa   : > { %v663_v10 = vmax.f32 %v661_v55, %v662_v0  ;;  %v670_v11 = vmax.f32 %v668_v57, %v669_v1  ;;  %v676_v12 = vrot.slane %v675_v2, 1  ;;  %v683_v13 = vrot.slane %v682_v3, 1 }
  0xfb   : > { %v691_v16 = vmax.f32 %v689_v60, %v690_v5  ;;  %v698_v17 = vmax.f32 %v696_v61, %v697_v7  ;;  %v700_v22 = vrot.slane %v699_v8, 4  ;;  %v707_v23 = vrot.slane %v706_v9, 4 }
  0xfc   : > { %v769_v24 = vsub.f32 %v1719_v14, %v663_v10  ;;  %v770_v25 = vsub.f32 %v1721_v15, %v670_v11  ;;  %v677_v26 = vmax.f32 %v675_v2, %v676_v12  ;;  %v684_v27 = vmax.f32 %v682_v3, %v683_v13 }
  0xfd   : > { %v773_v28 = vsub.f32 %v1723_v18, %v691_v16  ;;  %v774_v29 = vsub.f32 %v1725_v19, %v698_v17  ;;  %v701_v31 = vmax.f32 %v699_v8, %v700_v22  ;;  %v708_v32 = vmax.f32 %v706_v9, %v707_v23  ;;  %v457_v22 = vpop.permute.xlu0 %456 }
  0xfe   : > { %v785_v33 = vmul.f32 1.442695, %v769_v24  ;;  %v787_v34 = vmul.f32 1.442695, %v770_v25  ;;  %v771_v35 = vsub.f32 %v1727_v20, %v677_v26  ;;  %v772_v36 = vsub.f32 %v1729_v21, %v684_v27 }
  0xff   : > { %v793_v37 = vmul.f32 1.442695, %v773_v28  ;;  %v795_v38 = vmul.f32 1.442695, %v774_v29  ;;  %v702_v39 = vrot.slane %v701_v31, 2  ;;  %v709_v14 = vrot.slane %v708_v32, 2 }
 0x100   : > { %1435 = vpow2.f32 %v785_v33  ;;  %v789_v15 = vmul.f32 1.442695, %v771_v35  ;;  %v791_v40 = vmul.f32 1.442695, %v772_v36  ;;  %v500_v18 = vrot.slane %v1697_v49, %v1660_v4 }
 0x101   : > { %1437 = vpow2.f32 %v787_v34  ;;  %v703_v19 = vmax.f32 %v701_v31, %v702_v39  ;;  %v710_v41 = vmax.f32 %v708_v32, %v709_v14  ;;  %v504_v43 = vrot.slane %v1697_v49, %v1662_v6 }
 0x102   : > { %1439 = vpow2.f32 %v793_v37  ;;  %v553_v20 = vadd.f32 %v500_v18, %v443_v42  ;;  %v596_v21 = vrot.slane %v1693_v45, %v1660_v4  ;;  %v600_v44 = vrot.slane %v1693_v45, %v1662_v6 }
 0x103   : > { %1441 = vpow2.f32 %v795_v38  ;;  %v704_v46 = vrot.slane %v703_v19, 1  ;;  %v711_v47 = vrot.slane %v710_v41, 1  ;;  %v554_v48 = vadd.f32 %v504_v43, %v443_v42 }
 0x104   : > { %1443 = vpow2.f32 %v789_v15  ;;  %v1769_v50 = vmul.f32 %v596_v21, %v553_v20  ;;  %v508_v52 = vrot.slane %v1707_v56, %v1660_v4  ;;  %v512_v53 = vrot.slane %v1707_v56, %v1662_v6 }
 0x105   : > { %1445 = vpow2.f32 %v791_v40  ;;  %v705_v54 = vmax.f32 %v703_v19, %v704_v46  ;;  %v712_v55 = vmax.f32 %v710_v41, %v711_v47  ;;  %v1775_v57 = vmul.f32 %v600_v44, %v554_v48 }
 0x106   : > { %v713_v59 = vsel %vm216_vm0, %v1769_v50, -inf  ;;  %v555_v60 = vadd.f32 %v508_v52, %v450_v58  ;;  %v556_v61 = vadd.f32 %v512_v53, %v450_v58  ;;  %v604_v0 = vrot.slane %v1701_v51, %v1660_v4 }
 0x107   : > { %v775_v1 = vsub.f32 %v1747_v62, %v705_v54  ;;  %v776_v2 = vsub.f32 %v1749_v63, %v712_v55  ;;  %v714_v3 = vrot.slane %v713_v59, 4  ;;  %v720_v5 = vsel %vm216_vm0, %v1775_v57, -inf }
 0x108   : > { %v721_v7 = vrot.slane %v720_v5, 4  ;;  %v608_v8 = vrot.slane %v1701_v51, %v1662_v6  ;;  %v1787_v9 = vmul.f32 %v604_v0, %v555_v60  ;;  %v354_v10 = vcombine.high %v1693_v45, %v1693_v45 }
 0x109   : > { %v797_v11 = vmul.f32 1.442695, %v775_v1  ;;  %v799_v12 = vmul.f32 1.442695, %v776_v2  ;;  %v715_v13 = vmax.f32 %v713_v59, %v714_v3  ;;  %v406_v62 = vcombine.high %v1697_v49, %v1697_v49 }
 0x10a   : > { %v722_v63 = vmax.f32 %v720_v5, %v721_v7  ;;  %v1793_v16 = vmul.f32 %v608_v8, %v556_v61  ;;  %v727_v17 = vsel %vm216_vm0, %v1787_v9, -inf  ;;  %v612_v23 = vrot.slane %v354_v10, %v1660_v4 }
 0x10b   : > { %1447 = vpow2.f32 %v797_v11  ;;  %v716_v24 = vrot.slane %v715_v13, 2  ;;  %v728_v25 = vrot.slane %v727_v17, 4  ;;  %v516_v45 = vrot.slane %v406_v62, %v1660_v4 }
 0x10c   : > { %1449 = vpow2.f32 %v799_v12  ;;  %v723_v26 = vrot.slane %v722_v63, 2  ;;  %v734_v27 = vsel %vm216_vm0, %v1793_v16, -inf  ;;  %v520_v49 = vrot.slane %v406_v62, %v1662_v6 }
 0x10d   : > { %v1802_v28 = vpop.eup %1435  ;;  %v717_v29 = vmax.f32 %v715_v13, %v716_v24  ;;  %v729_v31 = vmax.f32 %v727_v17, %v728_v25  ;;  %v735_v32 = vrot.slane %v734_v27, 4  ;;  %v557_v33 = vadd.f32 %v516_v45, %v457_v22 }
 0x10e   : > { %v1804_v34 = vpop.eup %1437  ;;  %v1808_v35 = vsel %vm216_vm0, %v1802_v28, 0.0  ;;  %v724_v36 = vmax.f32 %v722_v63, %v723_v26  ;;  %v558_v37 = vadd.f32 %v520_v49, %v457_v22  ;;  %v616_v38 = vrot.slane %v354_v10, %v1662_v6 }
 0x10f   : > { %v1811_v39 = vpop.eup %1439  ;;  %v818_v14 = vrot.slane %v1808_v35, 4  ;;  %v1816_v15 = vsel %vm216_vm0, %v1804_v34, 0.0  ;;  %v718_v40 = vrot.slane %v717_v29, 1  ;;  %v730_v18 = vrot.slane %v729_v31, 2 }
 0x110   : > { %v1818_v19 = vpop.eup %1441  ;;  %v825_v41 = vrot.slane %v1816_v15, 4  ;;  %v1823_v42 = vsel %vm216_vm0, %v1811_v39, 0.0  ;;  %v725_v43 = vrot.slane %v724_v36, 1  ;;  %v736_v20 = vmax.f32 %v734_v27, %v735_v32 }
 0x111   : > { %v1825_v21 = vpop.eup %1443  ;;  %v846_v44 = vrot.slane %v1823_v42, 4  ;;  %v1830_v46 = vsel %vm216_vm0, %v1818_v19, 0.0  ;;  %v719_v47 = vmax.f32 %v717_v29, %v718_v40  ;;  %v731_v48 = vmax.f32 %v729_v31, %v730_v18 }
 0x112   : > { %v1832_v52 = vpop.eup %1445  ;;  %v853_v53 = vrot.slane %v1830_v46, 4  ;;  %v831_v54 = vsel %vm216_vm0, %v1825_v21, 0.0  ;;  %v726_v55 = vmax.f32 %v724_v36, %v725_v43  ;;  %v737_v58 = vrot.slane %v736_v20, 2 }
 0x113   : > { %v832_v59 = vrot.slane %v831_v54, 4  ;;  %v838_v60 = vsel %vm216_vm0, %v1832_v52, 0.0  ;;  %v777_v61 = vsub.f32 %v1769_v50, %v719_v47  ;;  %v732_v0 = vrot.slane %v731_v48, 1 }
 0x114   : > { %v839_v1 = vrot.slane %v838_v60, 4  ;;  %v778_v2 = vsub.f32 %v1775_v57, %v726_v55  ;;  %v738_v3 = vmax.f32 %v736_v20, %v737_v58  ;;  %v1841_v5 = vmul.f32 %v612_v23, %v557_v33 }
 0x115   : > { %v833_v7 = vadd.f32 %v832_v59, %v831_v54  ;;  %v801_v8 = vmul.f32 1.442695, %v777_v61  ;;  %v733_v10 = vmax.f32 %v731_v48, %v732_v0  ;;  %v1843_v11 = vmul.f32 %v616_v38, %v558_v37 }
 0x116   : > { %v840_v12 = vadd.f32 %v839_v1, %v838_v60  ;;  %v803_v13 = vmul.f32 1.442695, %v778_v2  ;;  %v739_v62 = vrot.slane %v738_v3, 1  ;;  %v741_v63 = vsel %vm216_vm0, %v1841_v5, -inf }
 0x117   : > { %v834_v17 = vrot.slane %v833_v7, 2  ;;  %1451 = vpow2.f32 %v801_v8  ;;  %v779_v50 = vsub.f32 %v1787_v9, %v733_v10  ;;  %v742_v22 = vrot.slane %v741_v63, 4 }
 0x118   : > { %v1848_v57 = vpop.eup %1447  ;;  %v841_v23 = vrot.slane %v840_v12, 2  ;;  %1453 = vpow2.f32 %v803_v13  ;;  %v740_v24 = vmax.f32 %v738_v3, %v739_v62  ;;  %v748_v25 = vsel %vm216_vm0, %v1843_v11, -inf  ;;  %v464_v3 = vpop.permute.xlu1 %463 }
 0x119   : > { %v1852_v45 = vpop.eup %1449  ;;  %v835_v26 = vadd.f32 %v834_v17, %v833_v7  ;;  %v859_v27 = vsel %vm216_vm0, %v1848_v57, 0.0  ;;  %v805_v49 = vmul.f32 1.442695, %v779_v50  ;;  %v743_v29 = vmax.f32 %v741_v63, %v742_v22 }
 0x11a   : > { %v842_v31 = vadd.f32 %v841_v23, %v840_v12  ;;  %v860_v32 = vrot.slane %v859_v27, 4  ;;  %v866_v9 = vsel %vm216_vm0, %v1852_v45, 0.0  ;;  %v780_v33 = vsub.f32 %v1793_v16, %v740_v24 }
 0x11b   : > { %v836_v36 = vrot.slane %v835_v26, 1  ;;  %v867_v37 = vrot.slane %v866_v9, 4  ;;  %1455 = vpow2.f32 %v805_v49  ;;  %v744_v38 = vrot.slane %v743_v29, 2 }
 0x11c   : > { %v843_v40 = vrot.slane %v842_v31, 1  ;;  %v861_v18 = vadd.f32 %v860_v32, %v859_v27  ;;  %v807_v43 = vmul.f32 1.442695, %v780_v33  ;;  %v749_v20 = vrot.slane %v748_v25, 4 }
 0x11d   : > { %v837_v47 = vadd.f32 %v836_v36, %v835_v26  ;;  %v868_v48 = vadd.f32 %v867_v37, %v866_v9  ;;  %v745_v54 = vmax.f32 %v743_v29, %v744_v38  ;;  %v356_v55 = vcombine.high %v1701_v51, %v1701_v51 }
 0x11e   : > { %v844_v58 = vadd.f32 %v843_v40, %v842_v31  ;;  %v862_v59 = vrot.slane %v861_v18, 2  ;;  %1457 = vpow2.f32 %v807_v43  ;;  %v750_v60 = vmax.f32 %v748_v25, %v749_v20 }
 0x11f   : > { %1459 = vrcp.f32 %v837_v47  ;;  %v869_v16 = vrot.slane %v868_v48, 2  ;;  %v746_v61 = vrot.slane %v745_v54, 1  ;;  %v408_v0 = vcombine.high %v1707_v56, %v1707_v56 }
 0x120   : > { %1461 = vrcp.f32 %v844_v58  ;;  %v863_v1 = vadd.f32 %v862_v59, %v861_v18  ;;  %v751_v2 = vrot.slane %v750_v60, 2  ;;  %v620_v7 = vrot.slane %v356_v55, %v1660_v4 }
 0x121   : > { %v870_v8 = vadd.f32 %v869_v16, %v868_v48  ;;  %v747_v10 = vmax.f32 %v745_v54, %v746_v61  ;;  %v524_v51 = vrot.slane %v408_v0, %v1660_v4  ;;  %v528_v12 = vrot.slane %v408_v0, %v1662_v6 }
 0x122   : > { %v864_v13 = vrot.slane %v863_v1, 1  ;;  %v752_v62 = vmax.f32 %v750_v60, %v751_v2  ;;  %v624_v63 = vrot.slane %v356_v55, %v1662_v6  ;;  %v819_v56 = vadd.f32 %v818_v14, %v1808_v35 }
 0x123   : > { %v871_v17 = vrot.slane %v870_v8, 1  ;;  %v781_v50 = vsub.f32 %v1841_v5, %v747_v10  ;;  %v559_v22 = vadd.f32 %v524_v51, %v464_v3  ;;  %v560_v23 = vadd.f32 %v528_v12, %v464_v3 }
 0x124   : > { %v1871_v24 = vpop.eup %1451  ;;  %v865_v25 = vadd.f32 %v864_v13, %v863_v1  ;;  %v753_v26 = vrot.slane %v752_v62, 1  ;;  %v820_v27 = vrot.slane %v819_v56, 2  ;;  %v826_v49 = vadd.f32 %v825_v41, %v1816_v15 }
 0x125   : > { %v1876_v29 = vpop.eup %1453  ;;  %v872_v31 = vadd.f32 %v871_v17, %v870_v8  ;;  %v873_v35 = vsel %vm216_vm0, %v1871_v24, 0.0  ;;  %v809_v14 = vmul.f32 1.442695, %v781_v50  ;;  %v1880_v32 = vmul.f32 %v620_v7, %v559_v22 }
 0x126   : > { %1463 = vrcp.f32 %v865_v25  ;;  %v874_v5 = vrot.slane %v873_v35, 4  ;;  %v880_v9 = vsel %vm216_vm0, %v1876_v29, 0.0  ;;  %v754_v33 = vmax.f32 %v752_v62, %v753_v26 }
 0x127   : > { %1465 = vrcp.f32 %v872_v31  ;;  %v881_v36 = vrot.slane %v880_v9, 4  ;;  %v1884_v37 = vmul.f32 %v624_v63, %v560_v23  ;;  %v755_v15 = vsel %vm216_vm0, %v1880_v32, -inf }
 0x128   : > { %v1888_v41 = vpop.eup %1455  ;;  %v875_v38 = vadd.f32 %v874_v5, %v873_v35  ;;  %v782_v40 = vsub.f32 %v1843_v11, %v754_v33  ;;  %1467 = vpow2.f32 %v809_v14  ;;  %v756_v18 = vrot.slane %v755_v15, 4 }
 0x129   : > { %v882_v43 = vadd.f32 %v881_v36, %v880_v9  ;;  %v887_v20 = vsel %vm216_vm0, %v1888_v41, 0.0  ;;  %v762_v47 = vsel %vm216_vm0, %v1884_v37, -inf  ;;  %v821_v48 = vadd.f32 %v820_v27, %v819_v56 }
 0x12a   : > { %v876_v54 = vrot.slane %v875_v38, 2  ;;  %v888_v55 = vrot.slane %v887_v20, 4  ;;  %v811_v58 = vmul.f32 1.442695, %v782_v40  ;;  %v757_v59 = vmax.f32 %v755_v15, %v756_v18 }
 0x12b   : > { %v1895_v60 = vpop.eup %1457  ;;  %v883_v16 = vrot.slane %v882_v43, 2  ;;  %v763_v61 = vrot.slane %v762_v47, 4  ;;  %v822_v0 = vrot.slane %v821_v48, 1  ;;  %v827_v11 = vrot.slane %v826_v49, 2 }
 0x12c   : > { %v1897_v1 = vpop.eup %1459  ;;  %v877_v2 = vadd.f32 %v876_v54, %v875_v38  ;;  %v889_v3 = vadd.f32 %v888_v55, %v887_v20  ;;  %v894_v7 = vsel %vm216_vm0, %v1895_v60, 0.0  ;;  %1469 = vpow2.f32 %v811_v58 }
 0x12d   : > { %v1901_v8 = vpop.eup %1461  ;;  %v884_v10 = vadd.f32 %v883_v16, %v882_v43  ;;  %v895_v51 = vrot.slane %v894_v7, 4  ;;  %v758_v12 = vrot.slane %v757_v59, 2  ;;  %v764_v13 = vmax.f32 %v762_v47, %v763_v61 }
 0x12e   : > { %v878_v62 = vrot.slane %v877_v2, 1  ;;  %v890_v63 = vrot.slane %v889_v3, 2  ;;  %v823_v56 = vadd.f32 %v822_v0, %v821_v48  ;;  %v828_v17 = vadd.f32 %v827_v11, %v826_v49  ;;  %v299_v48 = vpop.f32.mrf.mxu1 }
 0x12f   : > { %v885_v50 = vrot.slane %v884_v10, 1  ;;  %v896_v22 = vadd.f32 %v895_v51, %v894_v7  ;;  %v759_v23 = vmax.f32 %v757_v59, %v758_v12  ;;  %v765_v25 = vrot.slane %v764_v13, 2 }
 0x130   : > { %v879_v26 = vadd.f32 %v878_v62, %v877_v2  ;;  %v891_v27 = vadd.f32 %v890_v63, %v889_v3  ;;  %v829_v31 = vrot.slane %v828_v17, 1  ;;  %v847_v35 = vadd.f32 %v846_v44, %v1823_v42 }
 0x131   : > { %v886_v14 = vadd.f32 %v885_v50, %v884_v10  ;;  %v897_v5 = vrot.slane %v896_v22, 2  ;;  %v760_v9 = vrot.slane %v759_v23, 1  ;;  %v766_v33 = vmax.f32 %v764_v13, %v765_v25 }
 0x132   : > { %1471 = vrcp.f32 %v879_v26  ;;  %v892_v36 = vrot.slane %v891_v27, 1  ;;  %v830_v15 = vadd.f32 %v829_v31, %v828_v17  ;;  %v848_v38 = vrot.slane %v847_v35, 2 }
 0x133   : > { %v1464_v49 = vpop.eup %1463  ;;  %1473 = vrcp.f32 %v886_v14  ;;  %v898_v40 = vadd.f32 %v897_v5, %v896_v22  ;;  %v761_v18 = vmax.f32 %v759_v23, %v760_v9  ;;  %v767_v43 = vrot.slane %v766_v33, 1 }
 0x134   : > { %v1466_v20 = vpop.eup %1465  ;;  %v893_v47 = vadd.f32 %v892_v36, %v891_v27  ;;  %v849_v54 = vadd.f32 %v848_v38, %v847_v35  ;;  %v854_v42 = vadd.f32 %v853_v53, %v1830_v46  ;;  %1475 = vrcp.f32 %v823_v56  ;;  %v301_v46 = vpop.f32.mrf.mxu1 }
 0x135   : > { %v1909_v44 = vpop.eup %1467  ;;  %v899_v55 = vrot.slane %v898_v40, 1  ;;  %v768_v58 = vmax.f32 %v766_v33, %v767_v43  ;;  %v783_v59 = vsub.f32 %v1880_v32, %v761_v18  ;;  %1477 = vrcp.f32 %v830_v15 }
 0x136   : > { %1479 = vrcp.f32 %v893_v47  ;;  %v901_v16 = vsel %vm216_vm0, %v1909_v44, 0.0  ;;  %v850_v61 = vrot.slane %v849_v54, 1  ;;  %v855_v0 = vrot.slane %v854_v42, 2 }
 0x137   : > { %v900_v11 = vadd.f32 %v899_v55, %v898_v40  ;;  %v902_v2 = vrot.slane %v901_v16, 4  ;;  %v784_v3 = vsub.f32 %v1884_v37, %v768_v58  ;;  %v813_v7 = vmul.f32 1.442695, %v783_v59 }
 0x138   : > { %v851_v53 = vadd.f32 %v850_v61, %v849_v54  ;;  %v856_v10 = vadd.f32 %v855_v0, %v854_v42  ;;  %v963_v17 = vcombine.low %v299_v48, %v301_v46  ;;  %v964_v37 = vcombine.high %v299_v48, %v301_v46 }
 0x139   : > { %v1915_v51 = vpop.eup %1469  ;;  %1481 = vrcp.f32 %v900_v11  ;;  %v903_v12 = vadd.f32 %v902_v2, %v901_v16  ;;  %v815_v32 = vmul.f32 1.442695, %v784_v3  ;;  %v1922_v26 = vmul.f32 %v1897_v1, %v1825_v21 }
 0x13a   : > { %v908_v13 = vsel %vm216_vm0, %v1915_v51, 0.0  ;;  %1483 = vpow2.f32 %v813_v7  ;;  %v857_v62 = vrot.slane %v856_v10, 1  ;;  %v971_v25 = vrot.slane %v963_v17, %v1685_v30 }
 0x13b   : > { %v904_v63 = vrot.slane %v903_v12, 2  ;;  %v909_v56 = vrot.slane %v908_v13, 4  ;;  %1485 = vpow2.f32 %v815_v32  ;;  %v978_v27 = vrot.slane %v964_v37, %v1685_v30 }
 0x13c   : > { %v858_v50 = vadd.f32 %v857_v62, %v856_v10  ;;  %1487 = vrcp.f32 %v851_v53  ;;  %v979_v5 = vcombine.high %v971_v25, %v971_v25  ;;  %v987_v9 = vrot.slane %v971_v25, %v1685_v30 }
 0x13d   : > { %v905_v22 = vadd.f32 %v904_v63, %v903_v12  ;;  %v910_v23 = vadd.f32 %v909_v56, %v908_v13  ;;  %v948_v36 = vmul.f32 %v1901_v8, %v1832_v52  ;;  %v951_v15 = vmul.f32 %v1464_v49, %v1848_v57 }
 0x13e   : > { %1489 = vrcp.f32 %v858_v50  ;;  %v980_v38 = vcombine.high %v978_v27, %v978_v27  ;;  %v1930_v40 = vrot.slane %v978_v27, %v1685_v30  ;;  %v952_v43 = vmul.f32 %v1466_v20, %v1852_v45 }
 0x13f   : > { %v1472_v31 = vpop.eup %1471  ;;  %v906_v35 = vrot.slane %v905_v22, 1  ;;  %v911_v14 = vrot.slane %v910_v23, 2  ;;  %v1001_v47 = vrot.slane %v979_v5, %v1685_v30  ;;  %v1939_v57 = vcombine.high %v987_v9, %v987_v9 }
 0x140   : > { %v1474_v33 = vpop.eup %1473  ;;  %v953_v54 = vmul.f32 %v1472_v31, %v1871_v24  ;;  %v1937_v52 = vrot.slane %v980_v38, %v1685_v30  ;;  %v1946_v24 = vcombine.high %v1930_v40, %v1930_v40  ;;  %v1016_v59 = vrot.slane %v987_v9, %v1660_v4 }
 0x141   : > { %v1476_v21 = vpop.eup %1475  ;;  %v907_v1 = vadd.f32 %v906_v35, %v905_v22  ;;  %v912_v18 = vadd.f32 %v911_v14, %v910_v23  ;;  %v954_v42 = vmul.f32 %v1474_v33, %v1876_v29  ;;  %v1011_v58 = vcombine.high %v1001_v47, %v1001_v47 }
 0x142   : > { %v1478_v48 = vpop.eup %1477  ;;  %v945_v55 = vmul.f32 %v1476_v21, %v1802_v28  ;;  %v1950_v30 = vcombine.high %v1937_v52, %v1937_v52  ;;  %v1020_v16 = vrot.slane %v987_v9, %v1662_v6  ;;  %v1024_v28 = vrot.slane %v1001_v47, %v1660_v4 }
 0x143   : > { %v1480_v8 = vpop.eup %1479  ;;  %v913_v49 = vrot.slane %v912_v18, 1  ;;  %1491 = vrcp.f32 %v907_v1  ;;  %v946_v45 = vmul.f32 %v1478_v48, %v1804_v34  ;;  %v1028_v34 = vrot.slane %v1001_v47, %v1662_v6 }
 0x144   : > { %v955_v20 = vmul.f32 %v1480_v8, %v1888_v41  ;;  %v1032_v41 = vrot.slane %v1939_v57, %v1660_v4  ;;  %v1036_v0 = vrot.slane %v1939_v57, %v1662_v6  ;;  %v1040_v11 = vrot.slane %v1011_v58, %v1660_v4 }
 0x145   : > { %v914_v29 = vadd.f32 %v913_v49, %v912_v18  ;;  %v1044_v7 = vrot.slane %v1011_v58, %v1662_v6  ;;  %v1048_v46 = vrot.slane %v1930_v40, %v1660_v4  ;;  %v1052_v12 = vrot.slane %v1930_v40, %v1662_v6 }
 0x146   : > { %v1482_v61 = vpop.eup %1481  ;;  %v1056_v32 = vrot.slane %v1937_v52, %v1660_v4  ;;  %v1064_v56 = vrot.slane %v1946_v24, %v1660_v4  ;;  %v1068_v17 = vrot.slane %v1946_v24, %v1662_v6  ;;  %v1072_v22 = vrot.slane %v1950_v30, %v1660_v4 }
 0x147   : > { %v1961_v2 = vpop.eup %1483  ;;  %1493 = vrcp.f32 %v914_v29  ;;  %v1964_v3 = vmul.f32 %v1482_v61, %v1895_v60  ;;  %v1060_v60 = vrot.slane %v1937_v52, %v1662_v6  ;;  %v1093_v23 = vmul.f32 %v1016_v59, %v945_v55 }
 0x148   : > { %v1969_v53 = vpop.eup %1485  ;;  %v915_v10 = vsel %vm216_vm0, %v1961_v2, 0.0  ;;  %v1076_v31 = vrot.slane %v1950_v30, %v1662_v6  ;;  %v1094_v35 = vmul.f32 %v1020_v16, %v946_v45  ;;  %v1095_v14 = vmul.f32 %v1024_v28, %v1922_v26 }
 0x149   : > { %v1488_v13 = vpop.eup %1487  ;;  %v916_v62 = vrot.slane %v915_v10, 4  ;;  %v922_v63 = vsel %vm216_vm0, %v1969_v53, 0.0  ;;  %v1096_v33 = vmul.f32 %v1028_v34, %v948_v36  ;;  %v1099_v38 = vmul.f32 %v1040_v11, %v951_v15 }
 0x14a   : > { %v923_v50 = vrot.slane %v922_v63, 4  ;;  %v949_v37 = vmul.f32 %v1488_v13, %v1811_v39  ;;  %v1100_v39 = vmul.f32 %v1044_v7, %v952_v43  ;;  %v1101_v1 = vmul.f32 %v1048_v46, %v953_v54 }
 0x14b   : > { %v1490_v25 = vpop.eup %1489  ;;  %v917_v27 = vadd.f32 %v916_v62, %v915_v10  ;;  %v1102_v47 = vmul.f32 %v1052_v12, %v954_v42  ;;  %v1992_v48 = vmul.f32 %v1056_v32, %v955_v20  ;;  %v1109_v52 = vsel %vm216_vm0, %v1093_v23, 0.0 }
 0x14c   : > { %v924_v5 = vadd.f32 %v923_v50, %v922_v63  ;;  %v950_v9 = vmul.f32 %v1490_v25, %v1818_v19  ;;  %v1097_v21 = vmul.f32 %v1032_v41, %v949_v37  ;;  %v1110_v8 = vrot.slane %v1109_v52, 4 }
 0x14d   : > { %v918_v40 = vrot.slane %v917_v27, 2  ;;  %v1116_v49 = vsel %vm216_vm0, %v1094_v35, 0.0  ;;  %v1123_v26 = vsel %vm216_vm0, %v1095_v14, 0.0  ;;  %v1130_v58 = vsel %vm216_vm0, %v1096_v33, 0.0 }
 0x14e   : > { %v925_v18 = vrot.slane %v924_v5, 2  ;;  %v1117_v36 = vrot.slane %v1116_v49, 4  ;;  %v1124_v15 = vrot.slane %v1123_v26, 4  ;;  %v1098_v54 = vmul.f32 %v1036_v0, %v950_v9 }
 0x14f   : > { %v919_v57 = vadd.f32 %v918_v40, %v917_v27  ;;  %v1111_v45 = vadd.f32 %v1110_v8, %v1109_v52  ;;  %v1131_v42 = vrot.slane %v1130_v58, 4  ;;  %v1137_v16 = vsel %vm216_vm0, %v1097_v21, 0.0 }
 0x150   : > { %v1492_v55 = vpop.eup %1491  ;;  %v926_v19 = vadd.f32 %v925_v18, %v924_v5  ;;  %v1118_v29 = vadd.f32 %v1117_v36, %v1116_v49  ;;  %v1125_v59 = vadd.f32 %v1124_v15, %v1123_v26  ;;  %v1138_v12 = vrot.slane %v1137_v16, 4 }
 0x151   : > { %v920_v43 = vrot.slane %v919_v57, 1  ;;  %v957_v61 = vmul.f32 %v1492_v55, %v1909_v44  ;;  %v1112_v34 = vrot.slane %v1111_v45, 2  ;;  %v1132_v41 = vadd.f32 %v1131_v42, %v1130_v58 }
 0x152   : > { %v927_v20 = vrot.slane %v926_v19, 1  ;;  %v1119_v46 = vrot.slane %v1118_v29, 2  ;;  %v1126_v10 = vrot.slane %v1125_v59, 2  ;;  %v1139_v50 = vadd.f32 %v1138_v12, %v1137_v16 }
 0x153   : > { %v921_v28 = vadd.f32 %v920_v43, %v919_v57  ;;  %v1113_v32 = vadd.f32 %v1112_v34, %v1111_v45  ;;  %v1133_v13 = vrot.slane %v1132_v41, 2  ;;  %v1104_v37 = vmul.f32 %v1060_v60, %v1964_v3 }
 0x154   : > { %v1494_v11 = vpop.eup %1493  ;;  %v928_v7 = vadd.f32 %v927_v20, %v926_v19  ;;  %v1120_v62 = vadd.f32 %v1119_v46, %v1118_v29  ;;  %v1127_v63 = vadd.f32 %v1126_v10, %v1125_v59  ;;  %v1144_v25 = vsel %vm216_vm0, %v1098_v54, 0.0 }
 0x155   : > { %1495 = vrcp.f32 %v921_v28  ;;  %v958_v0 = vmul.f32 %v1494_v11, %v1915_v51  ;;  %v1114_v23 = vrot.slane %v1113_v32, 1  ;;  %v1134_v44 = vadd.f32 %v1133_v13, %v1132_v41 }
 0x156   : > { %1497 = vrcp.f32 %v928_v7  ;;  %v1121_v27 = vrot.slane %v1120_v62, 1  ;;  %v1128_v35 = vrot.slane %v1127_v63, 1  ;;  %v1140_v14 = vrot.slane %v1139_v50, 2 }
 0x157   : > { %v1145_v5 = vrot.slane %v1144_v25, 4  ;;  %v1105_v51 = vmul.f32 %v1064_v56, %v957_v61  ;;  %v1106_v9 = vmul.f32 %v1068_v17, %v958_v0  ;;  %v1151_v33 = vsel %vm216_vm0, %v1099_v38, 0.0 }
 0x158   : > { %v1158_v3 = vsel %vm216_vm0, %v1100_v39, 0.0  ;;  %v2011_v60 = vadd.f32 %v1114_v23, %v1113_v32  ;;  %v1135_v40 = vrot.slane %v1134_v44, 1  ;;  %v1141_v21 = vadd.f32 %v1140_v14, %v1139_v50 }
 0x159   : > { %v1146_v18 = vadd.f32 %v1145_v5, %v1144_v25  ;;  %v2013_v52 = vadd.f32 %v1121_v27, %v1120_v62  ;;  %v1152_v57 = vrot.slane %v1151_v33, 4  ;;  %v1159_v8 = vrot.slane %v1158_v3, 4 }
 0x15a   : > { %v1165_v49 = vsel %vm216_vm0, %v1101_v1, 0.0  ;;  %v2016_v56 = vadd.f32 %v1128_v35, %v1127_v63  ;;  %v1172_v17 = vsel %vm216_vm0, %v1102_v47, 0.0  ;;  %v1179_v19 = vsel %vm216_vm0, %v1992_v48, 0.0 }
 0x15b   : > { %v1147_v26 = vrot.slane %v1146_v18, 2  ;;  %v1166_v24 = vrot.slane %v1165_v49, 4  ;;  %v1153_v38 = vadd.f32 %v1152_v57, %v1151_v33  ;;  %v1160_v55 = vadd.f32 %v1159_v8, %v1158_v3 }
 0x15c   : > { %v1173_v39 = vrot.slane %v1172_v17, 4  ;;  %v1142_v36 = vrot.slane %v1141_v21, 1  ;;  %v1180_v43 = vrot.slane %v1179_v19, 4  ;;  %v1186_v1 = vsel %vm216_vm0, %v1104_v37, 0.0 }
 0x15d   : > { %v1148_v15 = vadd.f32 %v1147_v26, %v1146_v18  ;;  %v1167_v58 = vadd.f32 %v1166_v24, %v1165_v49  ;;  %v1154_v54 = vrot.slane %v1153_v38, 2  ;;  %v1161_v45 = vrot.slane %v1160_v55, 2 }
 0x15e   : > { %v1174_v42 = vadd.f32 %v1173_v39, %v1172_v17  ;;  %v1181_v59 = vadd.f32 %v1180_v43, %v1179_v19  ;;  %v1187_v47 = vrot.slane %v1186_v1, 4  ;;  %v1193_v34 = vsel %vm216_vm0, %v1105_v51, 0.0 }
 0x15f   : > { %v1149_v20 = vrot.slane %v1148_v15, 1  ;;  %v1168_v29 = vrot.slane %v1167_v58, 2  ;;  %v1155_v16 = vadd.f32 %v1154_v54, %v1153_v38  ;;  %v1162_v28 = vadd.f32 %v1161_v45, %v1160_v55 }
 0x160   : > { %v1175_v61 = vrot.slane %v1174_v42, 2  ;;  %v1136_v41 = vadd.f32 %v1135_v40, %v1134_v44  ;;  %v1182_v7 = vrot.slane %v1181_v59, 2  ;;  %v1188_v46 = vadd.f32 %v1187_v47, %v1186_v1 }
 0x161   : > { %v1169_v11 = vadd.f32 %v1168_v29, %v1167_v58  ;;  %v1156_v0 = vrot.slane %v1155_v16, 1  ;;  %v1163_v32 = vrot.slane %v1162_v28, 1  ;;  %v1143_v63 = vadd.f32 %v1142_v36, %v1141_v21 }
 0x162   : > { %v1496_v48 = vpop.eup %1495  ;;  %v1176_v13 = vadd.f32 %v1175_v61, %v1174_v42  ;;  %v1189_v50 = vrot.slane %v1188_v46, 2  ;;  %v1194_v37 = vrot.slane %v1193_v34, 4  ;;  %v1150_v44 = vadd.f32 %v1149_v20, %v1148_v15 }
 0x163   : > { %v1498_v10 = vpop.eup %1497  ;;  %v959_v12 = vmul.f32 %v1496_v48, %v1961_v2  ;;  %v1170_v25 = vrot.slane %v1169_v11, 1  ;;  %v1200_v27 = vsel %vm216_vm0, %v1106_v9, 0.0  ;;  %v1157_v5 = vadd.f32 %v1156_v0, %v1155_v16 }
 0x164   : > { %v960_v62 = vmul.f32 %v1498_v10, %v1969_v53  ;;  %v1177_v35 = vrot.slane %v1176_v13, 1  ;;  %v1195_v14 = vadd.f32 %v1194_v37, %v1193_v34  ;;  %v1201_v53 = vrot.slane %v1200_v27, 4 }
 0x165   : > { %v1107_v23 = vmul.f32 %v1072_v22, %v959_v12  ;;  %v1164_v51 = vadd.f32 %v1163_v32, %v1162_v28  ;;  %v1183_v33 = vadd.f32 %v1182_v7, %v1181_v59  ;;  %v1190_v3 = vadd.f32 %v1189_v50, %v1188_v46 }
 0x166   : > { %v1108_v2 = vmul.f32 %v1076_v31, %v960_v62  ;;  %v1202_v40 = vadd.f32 %v1201_v53, %v1200_v27  ;;  %v1196_v4 = vrot.slane %v1195_v14, 2  ;;  %v1171_v9 = vadd.f32 %v1170_v25, %v1169_v11 }
 0x167   : > { %v1207_v22 = vsel %vm216_vm0, %v1107_v23, 0.0  ;;  %v1184_v18 = vrot.slane %v1183_v33, 1  ;;  %v1191_v30 = vrot.slane %v1190_v3, 1  ;;  %v1238_v49 = vsel %vm1237_vm2, %v2016_v56, %v2011_v60 }
 0x168   : > { %v1214_v21 = vsel %vm216_vm0, %v1108_v2, 0.0  ;;  %v1208_v57 = vrot.slane %v1207_v22, 4  ;;  %v1197_v31 = vadd.f32 %v1196_v4, %v1195_v14  ;;  %v1203_v8 = vrot.slane %v1202_v40, 2 }
 0x169   : > { %v1215_v6 = vrot.slane %v1214_v21, 4  ;;  %v1178_v26 = vadd.f32 %v1177_v35, %v1176_v13  ;;  %v1185_v38 = vadd.f32 %v1184_v18, %v1183_v33  ;;  %v1240_v19 = vsel %vm1239_vm3, %v1143_v63, %v1238_v49 }
 0x16a   : > { %v1209_v24 = vadd.f32 %v1208_v57, %v1207_v22  ;;  %v1198_v55 = vrot.slane %v1197_v31, 1  ;;  %v1204_v39 = vadd.f32 %v1203_v8, %v1202_v40  ;;  %v1242_v58 = vsel %vm1241_vm4, %v1157_v5, %v1240_v19 }
 0x16b   : > { %v1216_v17 = vadd.f32 %v1215_v6, %v1214_v21  ;;  %v1251_v43 = vsel %vm1237_vm2, %v1136_v41, %v2013_v52  ;;  %v1192_v60 = vadd.f32 %v1191_v30, %v1190_v3  ;;  %v1244_v54 = vsel %vm1243_vm5, %v1171_v9, %v1242_v58 }
 0x16c   : > { %v1210_v36 = vrot.slane %v1209_v24, 2  ;;  %v1205_v56 = vrot.slane %v1204_v39, 1  ;;  %v1252_v45 = vsel %vm1239_vm3, %v1150_v44, %v1251_v43  ;;  %v1246_v20 = vsel %vm1245_vm6, %v1185_v38, %v1244_v54 }
 0x16d   : > { %v1217_v15 = vrot.slane %v1216_v17, 2  ;;  %v1253_v29 = vsel %vm1241_vm4, %v1164_v51, %v1252_v45  ;;  %v1199_v59 = vadd.f32 %v1198_v55, %v1197_v31 }
 0x16e   : > { %v1211_v42 = vadd.f32 %v1210_v36, %v1209_v24  ;;  %v1206_v47 = vadd.f32 %v1205_v56, %v1204_v39  ;;  %v1254_v16 = vsel %vm1243_vm5, %v1178_v26, %v1253_v29 }
 0x16f   : > { %v1218_v1 = vadd.f32 %v1217_v15, %v1216_v17  ;;  %v1255_v52 = vsel %vm1245_vm6, %v1192_v60, %v1254_v16  ;;  %v1248_v34 = vsel %vm1247_vm7, %v1199_v59, %v1246_v20 }
 0x170   : > { %v1212_v28 = vrot.slane %v1211_v42, 1  ;;  %v1256_v48 = vsel %vm1247_vm7, %v1206_v47, %v1255_v52 }
 0x171   : > { %v1219_v61 = vrot.slane %v1218_v1, 1 }
 0x172   : > { %v1213_v41 = vadd.f32 %v1212_v28, %v1211_v42 }
 0x173   : > { %v1220_v11 = vadd.f32 %v1219_v61, %v1218_v1 }
 0x174   : > { %v1250_v7 = vsel %vm1249_vm8, %v1213_v41, %v1248_v34 }
 0x175   : > { %v1257_v46 = vsel %vm1249_vm8, %v1220_v11, %v1256_v48  ;;  %1260 = vst [vmem:[%s188_s23] sm:$0xff] %v1250_v7 }
 0x176   : > { %1261 = vst [vmem:[%s188_s23 + $0x8] sm:$0xff] %v1257_v46 }
 0x177   : > { %1512 = shalt.err (!%p1509_p5)
}
 0x178   : > { %s1513_s7 = scalar_lea.hbm %s2056_s29, 256  ;;  %s1517_s10 = scalar_lea.hbm %s2107_s3, 512 }
 0x179   : > { %p1514_p6 = scmp.ne.s32.totalorder %s2056_s29, %s1513_s7  ;;  %p1518_p10 = scmp.lt.s32.totalorder %s2056_s29, %s2107_s3 }
 0x17a   : > { %p1519_p11 = scmp.lt.s32.totalorder %s1517_s10, %s1513_s7 }
 0x17b   : > { %p1515_p7 = pnand %p1514_p6, %p1640_p4 }
 0x17c   : > { %p1520_p12 = por %p1519_p11, %p1518_p10 }
 0x17d   : > { %p1516_p9 = pneg %p1515_p7 }
 0x17f   : > { %p1521_p13 = pnand %p1520_p12, %p1516_p9 }
 0x181   : > { %1524 = shalt.err (!%p1521_p13)
}
 0x182   : > { %1377 = dma.vmem_to_hbm [thread:$0]  (%p1640_p4), %s2058_s26, 256, %s2056_s29, %s1263_s15  }
 0x183 PF: > { %p1383_p0 = scmp.ge.s32.totalorder %s1575_s17, 2  ;;  %s1291_s19 = sand.u32 1, %s1555_s12  }
 0x184   : > { %s1292_s21 = scalar_lea.sflag [#allocation3], %s1291_s19 }
 0x185   : > { %p1380_p1 = pnand %p1383_p0, %p1647_p8 }
 0x187   : > { %p1381_p2 = pneg %p1380_p1 }
 0x189   : > { %1550 = dma.done.wait (%p1381_p2), %s1292_s21, 256  }
 0x18a   : > { %1552 = vsyncadd (%p1381_p2), %s1292_s21, 4294967040  ;;  %s16_s17 = sadd.s32 1, %s1575_s17   ;;  %s2110_s12 = smov %s1559_s13 }
 0x18b   : > { %p13_p3 = scmp.ge.s32.totalorder %s16_s17, 4   ;;  %s2111_s13 = smov %s1563_s14 }
 0x18c   : > { %s2112_s14 = smov %s1653_s25  ;;  %s2113_s15 = smov %s1571_s16 }
 0x18d   : > { %s2114_s16 = smov %s2116_s20  ;;  %15 = sbr.rel (!%p13_p3) target bundleno = 4 (0x4), region = 67 }
 0x192   :  { %1297 = vsyncpa [#allocation3], 1 }
 0x193   :  { %1299 = vsyncpa [#allocation3 + $0x1], 1 }

</bundles_post_ra>
